<compile_context>
chip_gen: v7x
topology: tpu7x:2x2x1
jax: 0.10.0
libtpu: 0.0.40
codegen_flags: <defaults>
</compile_context>

<pallas_src>
import jax
import jax.numpy as jnp
from jax.experimental import pallas as pl
from jax.experimental.pallas import tpu as pltpu

_LANE = 128
_LOG_CLAMP = -100.0                 # PyTorch BCE clamps log terms at -100
_TARGET_BLOCK_M_ROWS = 8192         # 8192 rows x 128 lanes x 4 B = 4 MiB / f32 block buffer
_VMEM_LIMIT_BYTES = 28 << 20        # > v5e's 16 MiB default, < v7x's 32 MiB default


def _round_up(x: int, m: int) -> int:
    return ((x + m - 1) // m) * m


def _sublane(dtype) -> int:
    """Minimum second-minor tile dimension for a dtype."""
    itemsize = jnp.dtype(dtype).itemsize
    if itemsize >= 4:
        return 8
    if itemsize == 2:
        return 16
    return 32


def _num_tensorcores() -> int:
    """Best-effort TensorCore-per-device count (v7x has 2, v5e/v6e have 1)."""
    try:
        kind = jax.devices()[0].device_kind.lower()
    except Exception:
        return 1
    if "v7" in kind or "7x" in kind:
        return 2
    return 1


def _choose_block_m(rows: int, sub: int, num_cores: int) -> int:
    """Pick the row-block size.

    Single-TC chips: one big block (no pointless grid splitting).
    v7x (2 TCs): even, balanced step count so both cores get equal work.
    """
    rows_rounded = _round_up(rows, sub)
    if num_cores <= 1 or rows <= 2 * sub:
        return max(min(_TARGET_BLOCK_M_ROWS, rows_rounded), sub)
    # 2 TensorCores: want an even number of roughly equal steps.
    target_steps = 2 * pl.cdiv(rows, 2 * _TARGET_BLOCK_M_ROWS)
    block_m = _round_up(pl.cdiv(rows, target_steps), sub)
    return max(block_m, sub)


def _bce_math_f32(x, t):
    """Exact PyTorch sigmoid->BCE math (computed in f32, no cast of result)."""
    p = jax.nn.sigmoid(x.astype(jnp.float32))
    log_p = jnp.maximum(jnp.log(p), _LOG_CLAMP)
    log_1mp = jnp.maximum(jnp.log(1.0 - p), _LOG_CLAMP)
    t = t.astype(jnp.float32)
    return -(t * log_p + (1.0 - t) * log_1mp)


def _sigmoid_bce_kernel(x_ref, t_ref, o_ref):
    loss = _bce_math_f32(x_ref[...], t_ref[...])
    o_ref[...] = loss.astype(o_ref.dtype)


def sigmoid_bce_loss(x: jax.Array, target: jax.Array) -> jax.Array:
    """Elementwise sigmoid + BCE (reduction='none'), any shape / dtype."""
    assert x.shape == target.shape, "input/target must have the same shape"
    orig_shape = x.shape
    out_dtype = x.dtype
    n = x.size
    n_main = (n // _LANE) * _LANE

    # Inputs smaller than one lane row: plain jnp (kernel would be pure overhead).
    if n_main == 0:
        return _bce_math_f32(x, target).astype(out_dtype)

    xf = jnp.ravel(x)
    tf = jnp.ravel(target)
    rows = n_main // _LANE
    x2 = xf[:n_main].reshape(rows, _LANE)
    t2 = tf[:n_main].reshape(rows, _LANE)

    sub = max(_sublane(x.dtype), _sublane(target.dtype))
    block_m = _choose_block_m(rows, sub, _num_tensorcores())
    grid = (pl.cdiv(rows, block_m),)

    out2 = pl.pallas_call(
        _sigmoid_bce_kernel,
        out_shape=jax.ShapeDtypeStruct((rows, _LANE), out_dtype),
        grid_spec=pltpu.PrefetchScalarGridSpec(
            num_scalar_prefetch=0,
            grid=grid,
            in_specs=[
                pl.BlockSpec((block_m, _LANE), lambda i: (i, 0)),
                pl.BlockSpec((block_m, _LANE), lambda i: (i, 0)),
            ],
            out_specs=pl.BlockSpec((block_m, _LANE), lambda i: (i, 0)),
        ),
        compiler_params=pltpu.CompilerParams(
            dimension_semantics=("parallel",),
            vmem_limit_bytes=_VMEM_LIMIT_BYTES,
        ),
    )(x2, t2)

    main_flat = out2.reshape(-1)
    if n_main == n:
        return main_flat.reshape(orig_shape)

    # <=127-element ragged tail: plain jnp in the wrapper (negligible cost;
    # avoids full-tensor pad + slice HBM passes of the old padded path).
    tail = _bce_math_f32(xf[n_main:], tf[n_main:]).astype(out_dtype)
    return jnp.concatenate([main_flat, tail]).reshape(orig_shape)


def _reference(x, t):
    # Pure-JAX reference mirroring PyTorch's sigmoid -> BCE(reduction='none').
    return _bce_math_f32(x, t).astype(x.dtype)


if __name__ == "__main__":
    key = jax.random.PRNGKey(0)
    k1, k2, k3, k4, k5, k6 = jax.random.split(key, 6)

    # NCHW-shaped logits (scaled so some |x| > 17 exercise the clamp path)
    # and targets in [0, 1].  n % 128 == 0 -> fast aligned path.
    B, C, H, W = 2, 4, 16, 16
    x = jax.random.normal(k1, (B, C, H, W), dtype=jnp.float32) * 10.0
    target = jax.random.uniform(k2, (B, C, H, W), dtype=jnp.float32)

    loss = jax.block_until_ready(sigmoid_bce_loss(x, target))
    ref = _reference(x, target)
    assert loss.shape == x.shape
    assert jnp.allclose(loss, ref, atol=1e-5, rtol=1e-5), "mismatch (aligned f32)"

    # Ragged size (n not a multiple of 128): aligned prefix through the kernel,
    # tail in jnp.
    x_r = jax.random.normal(k3, (5, 7, 11), dtype=jnp.float32) * 10.0
    t_r = jax.random.uniform(k4, (5, 7, 11), dtype=jnp.float32)
    loss_r = jax.block_until_ready(sigmoid_bce_loss(x_r, t_r))
    ref_r = _reference(x_r, t_r)
    assert loss_r.shape == x_r.shape
    assert jnp.allclose(loss_r, ref_r, atol=1e-5, rtol=1e-5), "mismatch (ragged)"

    # bf16 I/O path (dtype-aware sublane rounding, halved HBM traffic).
    x_b = (jax.random.normal(k5, (B, C, H, W), dtype=jnp.float32) * 10.0).astype(jnp.bfloat16)
    t_b = jax.random.uniform(k6, (B, C, H, W), dtype=jnp.float32).astype(jnp.bfloat16)
    loss_b = jax.block_until_ready(sigmoid_bce_loss(x_b, t_b))
    ref_b = _reference(x_b, t_b)
    assert loss_b.shape == x_b.shape
    assert jnp.allclose(loss_b.astype(jnp.float32), ref_b.astype(jnp.float32),
                        atol=1e-2, rtol=1e-2), "mismatch (bf16)"

    print("KERNEL_OK")
</pallas_src>

<mosaic_0001>
module attributes {stable_mosaic.version = 11 : i64} {
  func.func @_sigmoid_bce_kernel(%arg0: i32, %arg1: memref<16x128xf32, #tpu.memory_space<vmem>>, %arg2: memref<16x128xf32, #tpu.memory_space<vmem>>, %arg3: memref<16x128xf32, #tpu.memory_space<vmem>>) attributes {dimension_semantics = [#tpu.dimension_semantics<parallel>], iteration_bounds = array<i64: 1>, scalar_prefetch = 0 : i64, scratch_operands = 0 : i64, tpu.core_type = #tpu.core_type<tc>, window_params = [{transform_indices = @transform_0, window_bounds = array<i64: 16, 128>}, {transform_indices = @transform_1, window_bounds = array<i64: 16, 128>}, {transform_indices = @transform_2, window_bounds = array<i64: 16, 128>}]} {
    %c0 = arith.constant 0 : index
    %c0_0 = arith.constant 0 : index
    %0 = vector.load %arg1[%c0, %c0_0] : memref<16x128xf32, #tpu.memory_space<vmem>>, vector<16x128xf32>
    %c0_1 = arith.constant 0 : index
    %c0_2 = arith.constant 0 : index
    %1 = vector.load %arg2[%c0_1, %c0_2] : memref<16x128xf32, #tpu.memory_space<vmem>>, vector<16x128xf32>
    %2 = arith.negf %0 : vector<16x128xf32>
    %3 = math.exp %2 : vector<16x128xf32>
    %cst = arith.constant 1.000000e+00 : f32
    %4 = vector.broadcast %cst : f32 to vector<16x128xf32>
    %5 = arith.addf %4, %3 : vector<16x128xf32>
    %6 = arith.divf %4, %5 : vector<16x128xf32>
    %7 = math.log %6 : vector<16x128xf32>
    %cst_3 = arith.constant -1.000000e+02 : f32
    %8 = vector.broadcast %cst_3 : f32 to vector<16x128xf32>
    %9 = arith.maximumf %7, %8 : vector<16x128xf32>
    %cst_4 = arith.constant 1.000000e+00 : f32
    %10 = vector.broadcast %cst_4 : f32 to vector<16x128xf32>
    %11 = arith.subf %10, %6 : vector<16x128xf32>
    %12 = math.log %11 : vector<16x128xf32>
    %cst_5 = arith.constant -1.000000e+02 : f32
    %13 = vector.broadcast %cst_5 : f32 to vector<16x128xf32>
    %14 = arith.maximumf %12, %13 : vector<16x128xf32>
    %15 = arith.mulf %1, %9 : vector<16x128xf32>
    %cst_6 = arith.constant 1.000000e+00 : f32
    %16 = vector.broadcast %cst_6 : f32 to vector<16x128xf32>
    %17 = arith.subf %16, %1 : vector<16x128xf32>
    %18 = arith.mulf %17, %14 : vector<16x128xf32>
    %19 = arith.addf %15, %18 : vector<16x128xf32>
    %cst_7 = arith.constant 0.000000e+00 : f32
    %20 = vector.broadcast %cst_7 : f32 to vector<16x128xf32>
    %21 = arith.subf %20, %19 : vector<16x128xf32>
    %c0_8 = arith.constant 0 : index
    %c0_9 = arith.constant 0 : index
    %22 = vector.load %arg3[%c0_8, %c0_9] : memref<16x128xf32, #tpu.memory_space<vmem>>, vector<16x128xf32>
    tpu.vector_store %arg3[%c0_8, %c0_9], %21 {strides = array<i32>} : memref<16x128xf32, #tpu.memory_space<vmem>>, vector<16x128xf32>,
    return
  }
  func.func @transform_0(%arg0: i32) -> (i32, i32) {
    %c0_i32 = arith.constant 0 : i32
    %c0_i32_0 = arith.constant 0 : i32
    return %arg0, %c0_i32 : i32, i32
  }
  func.func @transform_1(%arg0: i32) -> (i32, i32) {
    %c0_i32 = arith.constant 0 : i32
    %c0_i32_0 = arith.constant 0 : i32
    return %arg0, %c0_i32 : i32, i32
  }
  func.func @transform_2(%arg0: i32) -> (i32, i32) {
    %c0_i32 = arith.constant 0 : i32
    %c0_i32_0 = arith.constant 0 : i32
    return %arg0, %c0_i32 : i32, i32
  }
}

</mosaic_0001>

<bundles_post_ra>
// kernel: tpu_custom_call.1
= control target key start
LH: loop header
LB: loop body
LE: loop exit
PB: predicated region body
PF: predicated region fallthrough
CT: control target
= control target key end

     0   :  { %7 = vsyncpa [#allocation3], 0  ;;  %s260_s0 = inlined_call_operand.hbm [shape: f32[16,128], index: 0, kind: input, shape index: {}]   ;;  %s261_s1 = inlined_call_operand.hbm [shape: f32[16,128], index: 1, kind: input, shape index: {}]   ;;  %s262_s2 = inlined_call_operand.hbm [shape: f32[16,128], index: 2, kind: output, shape index: {}]  }
   0x1   :  { %8 = vsyncpa [#allocation6], 0 }
   0x2   :  { %9 = vsyncpa [#allocation4], 0  ;;  %s195_s9 = smov [#allocation2]   ;;  %s123_s13 = scalar_lea.hbm %s260_s0, 256 }
   0x3   :  { %s15_s10 = sshll.u32 %s195_s9, 4  ;;  %p124_p0 = scmp.ne.s32.totalorder %s260_s0, %s123_s13  ;;  %s16_s10 = int_to_ptr.vmem [resolvable:$true] %s15_s10 }
   0x4   :  { %p127_p1 = scmp.lt.u32.totalorder %s123_s13, %s260_s0 }
   0x6   :  { %p129_p2 = pnand %p127_p1, %p124_p0 }
   0x8   :  { %132 = shalt.err (!%p129_p2)
}
   0x9   :  { %s133_s18 = scalar_lea.vmem %s16_s10, 256  ;;  %p138_p4 = scmp.lt.s32.totalorder %s16_s10, %s16_s10 }
   0xa   :  { %p134_p3 = scmp.ne.s32.totalorder %s16_s10, %s133_s18  ;;  %p139_p5 = scmp.lt.s32.totalorder %s133_s18, %s133_s18 }
   0xc   :  { %p140_p6 = por %p139_p5, %p138_p4 }
   0xe   :  { %p141_p7 = pnand %p140_p6, %p134_p3 }
  0x10   :  { %144 = shalt.err (!%p141_p7)
}
  0x11   :  { %s196_s19 = smov 128   ;;  %s197_s20 = smov 8  }
  0x12   :  { %21 = dma.hbm_to_vmem [thread:$0]  %s260_s0, 256, %s16_s10, [#allocation3], %s196_s19, %s196_s19, %s197_s20  }
  0x13   :  { %s198_s23 = smov [#allocation5]   ;;  %s145_s27 = scalar_lea.hbm %s261_s1, 256 }
  0x14   :  { %s27_s24 = sshll.u32 %s198_s23, 4  ;;  %p146_p8 = scmp.ne.s32.totalorder %s261_s1, %s145_s27  ;;  %s28_s24 = int_to_ptr.vmem [resolvable:$true] %s27_s24 }
  0x15   :  { %p149_p9 = scmp.lt.u32.totalorder %s145_s27, %s261_s1 }
  0x17   :  { %p151_p10 = pnand %p149_p9, %p146_p8 }
  0x19   :  { %154 = shalt.err (!%p151_p10)
}
  0x1a   :  { %s155_s4 = scalar_lea.vmem %s28_s24, 256  ;;  %p160_p12 = scmp.lt.s32.totalorder %s28_s24, %s28_s24 }
  0x1b   :  { %p156_p11 = scmp.ne.s32.totalorder %s28_s24, %s155_s4  ;;  %p161_p13 = scmp.lt.s32.totalorder %s155_s4, %s155_s4 }
  0x1d   :  { %p162_p0 = por %p161_p13, %p160_p12 }
  0x1f   :  { %p163_p1 = pnand %p162_p0, %p156_p11 }
  0x21   :  { %166 = shalt.err (!%p163_p1)
}
  0x22   :  { %33 = dma.hbm_to_vmem [thread:$0]  %s261_s1, 256, %s28_s24, [#allocation6], %s196_s19, %s196_s19, %s197_s20  }
  0x23   :  { %189 = dma.done.wait [#allocation3], 256  }
  0x24   :  { %190 = vsyncadd [#allocation3], 4294967040 }
  0x25   :  { %191 = dma.done.wait [#allocation6], 256  }
  0x26   :  { %192 = vsyncadd [#allocation6], 4294967040  ;;  %v40_v0 = vld [vmem:[#allocation2] sm:$0xff]  ;;  %v41_v1 = vld [vmem:[#allocation2 + $0x8] sm:$0xff]  ;;  %s199_s1 = smov [#allocation7]  }
  0x27   :  { %v100_v2 = vmul.f32 -1.442695, %v40_v0  ;;  %v101_v3 = vmul.f32 -1.442695, %v41_v1  ;;  %v42_v13 = vld [vmem:[#allocation5] sm:$0xff]  ;;  %v43_v16 = vld [vmem:[#allocation5 + $0x8] sm:$0xff] }
  0x28   :  { %v72_v22 = vsub.f32 1.0, %v42_v13  ;;  %v73_v25 = vsub.f32 1.0, %v43_v16  ;;  %s87_s6 = sshll.u32 %s199_s1, 4  ;;  %s88_s6 = int_to_ptr.vmem [resolvable:$true] %s87_s6 }
  0x29   :  { %107 = vpow2.f32 %v100_v2  ;;  %s167_s7 = scalar_lea.vmem %s88_s6, 256  ;;  %p172_p3 = scmp.lt.s32.totalorder %s88_s6, %s88_s6 }
  0x2a   :  { %109 = vpow2.f32 %v101_v3  ;;  %p168_p2 = scmp.ne.s32.totalorder %s88_s6, %s167_s7  ;;  %p173_p4 = scmp.lt.s32.totalorder %s167_s7, %s167_s7 }
  0x2c   :  { %p174_p5 = por %p173_p4, %p172_p3 }
  0x2e   :  { %p175_p6 = pnand %p174_p5, %p168_p2 }
  0x33   :  { %v108_v4 = vpop.eup %107 }
  0x34   :  { %v110_v5 = vpop.eup %109  ;;  %v50_v6 = vadd.f32 1.0, %v108_v4 }
  0x35   :  { %v51_v7 = vadd.f32 1.0, %v110_v5 }
  0x36   :  { %111 = vrcp.f32 %v50_v6 }
  0x37   :  { %113 = vrcp.f32 %v51_v7 }
  0x40   :  { %v112_v8 = vpop.eup %111 }
  0x41   :  { %v114_v9 = vpop.eup %113  ;;  %115 = vlog2.f32 %v112_v8  ;;  %v62_v10 = vsub.f32 1.0, %v112_v8 }
  0x42   :  { %117 = vlog2.f32 %v114_v9  ;;  %v63_v11 = vsub.f32 1.0, %v114_v9 }
  0x43   :  { %119 = vlog2.f32 %v62_v10 }
  0x44   :  { %121 = vlog2.f32 %v63_v11 }
  0x4b   :  { %v116_v12 = vpop.eup %115 }
  0x4c   :  { %v118_v14 = vpop.eup %117  ;;  %v57_v15 = vmul.f32 0.6931472, %v116_v12 }
  0x4d   :  { %v120_v17 = vpop.eup %119  ;;  %v59_v18 = vmul.f32 0.6931472, %v118_v14 }
  0x4e   :  { %v122_v19 = vpop.eup %121  ;;  %v60_v20 = vmax.f32 %v57_v15, -100.0  ;;  %v65_v21 = vmul.f32 0.6931472, %v120_v17 }
  0x4f   :  { %v61_v23 = vmax.f32 %v59_v18, -100.0  ;;  %v67_v24 = vmul.f32 0.6931472, %v122_v19 }
  0x50   :  { %v68_v26 = vmax.f32 %v65_v21, -100.0  ;;  %v70_v27 = vmul.f32 %v60_v20, %v42_v13 }
  0x51   :  { %v69_v28 = vmax.f32 %v67_v24, -100.0  ;;  %v71_v29 = vmul.f32 %v61_v23, %v43_v16 }
  0x52   :  { %v74_v30 = vmul.f32 %v72_v22, %v68_v26 }
  0x53   :  { %v75_v31 = vmul.f32 %v73_v25, %v69_v28 }
  0x54   :  { %v76_v32 = vadd.f32 %v74_v30, %v70_v27 }
  0x55   :  { %v77_v33 = vadd.f32 %v75_v31, %v71_v29 }
  0x56   :  { %v78_v34 = vsub.f32 0.0, %v76_v32 }
  0x57   :  { %v79_v35 = vsub.f32 0.0, %v77_v33 }
  0x58   :  { %80 = vst [vmem:[#allocation7] sm:$0xff] %v78_v34 }
  0x59   :  { %81 = vst [vmem:[#allocation7 + $0x8] sm:$0xff] %v79_v35 }
  0x5a   :  { %178 = shalt.err (!%p175_p6)
}
  0x5b   :  { %s179_s10 = scalar_lea.hbm %s262_s2, 256 }
  0x5c   :  { %p180_p7 = scmp.ne.s32.totalorder %s262_s2, %s179_s10  ;;  %p183_p8 = scmp.lt.u32.totalorder %s179_s10, %s262_s2 }
  0x5e   :  { %p185_p9 = pnand %p183_p8, %p180_p7 }
  0x60   :  { %188 = shalt.err (!%p185_p9)
}
  0x61   :  { %93 = dma.vmem_to_hbm [thread:$0]  %s88_s6, 256, %s262_s2, [#allocation4], %s196_s19, %s196_s19, %s197_s20  }
  0x62   :  { %193 = dma.done.wait [#allocation4], 256  }
  0x63   :  { %194 = vsyncadd [#allocation4], 4294967040 }
  0x64   :  { %97 = vsyncpa [#allocation3], 1 }
  0x65   :  { %98 = vsyncpa [#allocation6], 1 }
  0x66   :  { %99 = vsyncpa [#allocation4], 1 }

</bundles_post_ra>
